<compile_context>
chip_gen: v7x
topology: tpu7x:2x2x1
jax: 0.10.0
libtpu: 0.0.40
codegen_flags: <defaults>
</compile_context>

<pallas_src>
import math
import functools

import jax
import jax.numpy as jnp
from jax.experimental import pallas as pl
from jax.experimental.pallas import tpu as pltpu

EPS_NORM = 1e-12   # torch F.normalize default eps (clamp_min on the norm)
EPS_DEN = 1e-9     # eps in the node-aggregation denominator


def _sigmoid(v):
    return 1.0 / (1.0 + jnp.exp(-v))


# ----------------------------------------------------------------------------
# Fused GraphProcess kernel: one grid step == one batch element.
# ----------------------------------------------------------------------------
def _graph_process_kernel(xc_ref, lhs_ref, bias_ref, isig_ref, aisig_ref,
                          w1s_ref, b1s_ref, w2s_ref, b2s_ref,
                          aw_ref, ab_ref, wfu_ref, bfu_ref, out_ref):
    xc = xc_ref[0]                                       # (C, HW) f32, natural order
    xb = xc.astype(jnp.bfloat16)
    xcat = jnp.concatenate([(xc * xc).astype(jnp.bfloat16), xb], axis=0)  # (2C, HW)

    # ---- GraphProjection ----------------------------------------------------
    # logits[j,q] = -0.5*||(x_q - a_j)/s_j||^2   (+ -1e30 outside node j's block)
    # Single K=2C bf16 matmul; t3 and the block mask are folded into bias_ref.
    logits = jnp.dot(lhs_ref[...], xcat,
                     preferred_element_type=jnp.float32) + bias_ref[...]  # (N, HW)

    # softmax over the bnod nodes of each block (masked entries underflow to 0)
    m = jnp.max(logits, axis=0, keepdims=True)           # (1, HW)
    e = jnp.exp(logits - m)
    sa = e * pl.reciprocal(jnp.sum(e, axis=0, keepdims=True), approx=True)
    # sa (N, HW) == block-diagonal soft-assignment Q in natural pixel order

    # node aggregation:
    #   nodes[j] = ( (sa @ x^T)[j]/s_j - a_j/s_j * sum_q sa[j,q] ) / (sum_sa + eps)
    sum_sa = jnp.sum(sa, axis=1, keepdims=True)          # (N, 1)
    sab = sa.astype(jnp.bfloat16)
    sa_x = jax.lax.dot_general(sab, xb, (((1,), (1,)), ((), ())),
                               preferred_element_type=jnp.float32)        # (N, C)
    nodes = (sa_x * isig_ref[...] - aisig_ref[...] * sum_sa) \
        * pl.reciprocal(sum_sa + EPS_DEN, approx=True)

    # F.normalize(dim=2) per node, F.normalize(dim=1) on the flattened row,
    # then GraphInference's F.normalize(dim=1) per node again.
    nrm = jnp.sqrt(jnp.sum(nodes * nodes, axis=1, keepdims=True))
    nodes = nodes / jnp.maximum(nrm, EPS_NORM)
    gsq = jnp.sum(jnp.sum(nodes * nodes, axis=1, keepdims=True), axis=0,
                  keepdims=True)                         # (1, 1)
    nodes = nodes / jnp.maximum(jnp.sqrt(gsq), EPS_NORM)
    nrm2 = jnp.sqrt(jnp.sum(nodes * nodes, axis=1, keepdims=True))
    graph = nodes / jnp.maximum(nrm2, EPS_NORM)          # (N, C)

    # ---- GraphInference -----------------------------------------------------
    # TODO(synk): GCN/BatchNorm/NodeAtt residual stack stubbed to identity, so
    # y4 == y2 == y1 == relu(graph) and the three branches collapse.
    y = jnp.maximum(graph, 0.0)                          # (N, C)
    p = jnp.max(y, axis=0, keepdims=True)                # global_max_pool -> (1, C)

    # channel attention — all three mlpCA / lineA heads at once, pure VPU/XLU:
    hid = jnp.sum(p[:, :, None] * w1s_ref[...], axis=1) + b1s_ref[...]    # (3, C)
    hid = jnp.maximum(hid, 0.0)
    wcat = _sigmoid(jnp.sum(hid[:, :, None] * w2s_ref[...], axis=1)
                    + b2s_ref[...])                      # (3, C): rows = w4, w2, w1
    a = jnp.sum(wcat * aw_ref[...], axis=1, keepdims=True) + ab_ref[...]  # (3, 1)
    amax = jnp.max(a, axis=0, keepdims=True)
    ea = jnp.exp(a - amax)
    att = ea * pl.reciprocal(jnp.sum(ea, axis=0, keepdims=True), approx=True)
    # combined per-channel gate (branches collapse because y4 == y2 == y1 here)
    cgate = jnp.sum(att * wcat, axis=0, keepdims=True)                    # (1, C)

    zf = jnp.dot(cgate * y, wfu_ref[...],
                 preferred_element_type=jnp.float32) + bfu_ref[...]       # lineFu

    # ---- GraphReprojection + residual ---------------------------------------
    # out[c, q] = sum_j zf[j, c] * sa[j, q] + x[c, q]   (block-diag sa, K=N)
    out = jax.lax.dot_general(zf.astype(jnp.bfloat16), sab,
                              (((0,), (0,)), ((), ())),
                              preferred_element_type=jnp.float32)         # (C, HW)
    out_ref[0] = out + xc


# ----------------------------------------------------------------------------
# Wrapper: natural (B, C, H*W) layout, batch-invariant precompute hoisted here.
# ----------------------------------------------------------------------------
def graph_process_forward(params, x, *, bnum, bnod, dim):
    B, C, H, W = x.shape
    assert C == dim and H % bnum == 0 and W % bnum == 0
    h, w = H // bnum, W // bnum
    nhw = H * W
    node_num = bnum * bnum * bnod

    xc = x.reshape(B, C, nhw)                 # free bitcast (row-major pixel order)

    # --- batch-invariant projection precompute (tiny, runs once per call) ---
    anchor = params["anchor"]                                  # (N, C)
    sig = jax.nn.sigmoid(params["sigma"])                      # (N, C)
    isig = 1.0 / sig
    isig2 = isig * isig
    a_isig2 = anchor * isig2
    t3 = jnp.sum(anchor * a_isig2, axis=1, keepdims=True)      # (N, 1)
    lhs = jnp.concatenate([-0.5 * isig2, a_isig2],
                          axis=1).astype(jnp.bfloat16)         # (N, 2C) fused LHS
    aisig = anchor * isig                                      # (N, C)

    # block-diagonal mask in natural pixel order + the -0.5*||a/s||^2 term
    q = jnp.arange(nhw, dtype=jnp.int32)
    q_blk = (q // W) // h * bnum + (q % W) // w                # pixel -> block id
    j_blk = jnp.arange(node_num, dtype=jnp.int32) // bnod      # node  -> block id
    bias = jnp.where(j_blk[:, None] == q_blk[None, :],
                     jnp.float32(0.0), jnp.float32(-1e30)) - 0.5 * t3  # (N, HW)

    def T(m):
        return jnp.transpose(m)

    # stacked (branch, c_in, c_out) mlpCA weights — no block-diag padding
    w1s = jnp.stack([T(params["mlpCA4"]["w1"]), T(params["mlpCA2"]["w1"]),
                     T(params["mlpCA1"]["w1"])], axis=0)       # (3, C, C)
    b1s = jnp.stack([params["mlpCA4"]["b1"], params["mlpCA2"]["b1"],
                     params["mlpCA1"]["b1"]], axis=0)          # (3, C)
    w2s = jnp.stack([T(params["mlpCA4"]["w2"]), T(params["mlpCA2"]["w2"]),
                     T(params["mlpCA1"]["w2"])], axis=0)       # (3, C, C)
    b2s = jnp.stack([params["mlpCA4"]["b2"], params["mlpCA2"]["b2"],
                     params["mlpCA1"]["b2"]], axis=0)          # (3, C)
    aw = jnp.concatenate([params["lineA4"]["w"], params["lineA2"]["w"],
                          params["lineA1"]["w"]], axis=0)      # (3, C)
    ab = jnp.stack([params["lineA4"]["b"][0], params["lineA2"]["b"][0],
                    params["lineA1"]["b"][0]]).reshape(3, 1)   # (3, 1)
    wfu_t = T(params["lineFu"]["w"])                           # (C, C)
    bfu = params["lineFu"]["b"][None, :]                       # (1, C)

    def full(shape):
        nd = len(shape)
        return pl.BlockSpec(shape, lambda b: (0,) * nd)

    out_c = pl.pallas_call(
        _graph_process_kernel,
        out_shape=jax.ShapeDtypeStruct((B, C, nhw), jnp.float32),
        grid=(B,),
        in_specs=[
            pl.BlockSpec((1, C, nhw), lambda b: (b, 0, 0)),    # xc (natural layout)
            full((node_num, 2 * C)),                           # fused proj LHS (bf16)
            full((node_num, nhw)),                             # block mask - 0.5*t3
            full((node_num, C)),                               # 1/sigma
            full((node_num, C)),                               # anchor/sigma
            full((3, C, C)),                                   # mlpCA layer-1 W
            full((3, C)),                                      # mlpCA layer-1 b
            full((3, C, C)),                                   # mlpCA layer-2 W
            full((3, C)),                                      # mlpCA layer-2 b
            full((3, C)),                                      # lineA weights
            full((3, 1)),                                      # lineA biases
            full((C, C)),                                      # lineFu W^T
            full((1, C)),                                      # lineFu b
        ],
        out_specs=pl.BlockSpec((1, C, nhw), lambda b: (b, 0, 0)),
        compiler_params=pltpu.CompilerParams(
            dimension_semantics=("parallel",),
            vmem_limit_bytes=32 * 1024 * 1024),
    )(xc, lhs, bias, isig, aisig, w1s, b1s, w2s, b2s, aw, ab, wfu_t, bfu)

    return out_c.reshape(B, C, H, W)                           # free bitcast


# ----------------------------------------------------------------------------
# Deterministic parameter init (shapes per the module __init__)
# ----------------------------------------------------------------------------
def init_params(key, node_num, dim):
    ks = jax.random.split(key, 16)

    def lin(k, out_d, in_d):
        kw, kb = jax.random.split(k)
        bound = 1.0 / math.sqrt(in_d)
        wgt = jax.random.uniform(kw, (out_d, in_d), jnp.float32, -bound, bound)
        bia = jax.random.uniform(kb, (out_d,), jnp.float32, -bound, bound)
        return wgt, bia

    params = {
        "anchor": jax.random.uniform(ks[0], (node_num, dim), jnp.float32),
        "sigma": jax.random.uniform(ks[1], (node_num, dim), jnp.float32),
    }
    for i, name in enumerate(["mlpCA4", "mlpCA2", "mlpCA1"]):
        w1, b1 = lin(ks[2 + 2 * i], dim, dim)
        w2, b2 = lin(ks[3 + 2 * i], dim, dim)
        params[name] = {"w1": w1, "b1": b1, "w2": w2, "b2": b2}
    for i, name in enumerate(["lineA4", "lineA2", "lineA1"]):
        wgt, bia = lin(ks[8 + i], 1, dim)
        params[name] = {"w": wgt, "b": bia}
    wfu, bfu = lin(ks[11], dim, dim)
    params["lineFu"] = {"w": wfu, "b": bfu}
    # NOTE: lineA (3x3) is defined in the module but never used in forward.
    return params


if __name__ == "__main__":
    bnum, bnod, dim = 2, 4, 32
    B, H, W = 2, 16, 16

    key = jax.random.PRNGKey(0)
    kx, kp = jax.random.split(key)
    x = jax.random.normal(kx, (B, dim, H, W), jnp.float32)
    params = init_params(kp, bnum * bnum * bnod, dim)

    fwd = jax.jit(functools.partial(graph_process_forward,
                                    bnum=bnum, bnod=bnod, dim=dim))
    out = fwd(params, x)
    jax.block_until_ready(out)
    assert out.shape == (B, dim, H, W)
    assert out.dtype == jnp.float32
    print("KERNEL_OK")
</pallas_src>

<mosaic_0001>
module attributes {stable_mosaic.version = 11 : i64} {
  func.func @_graph_process_kernel(%arg0: i32, %arg1: memref<1x32x256xf32, #tpu.memory_space<vmem>>, %arg2: memref<16x64xbf16, #tpu.memory_space<vmem>>, %arg3: memref<16x256xf32, #tpu.memory_space<vmem>>, %arg4: memref<16x32xf32, #tpu.memory_space<vmem>>, %arg5: memref<16x32xf32, #tpu.memory_space<vmem>>, %arg6: memref<3x32x32xf32, #tpu.memory_space<vmem>>, %arg7: memref<3x32xf32, #tpu.memory_space<vmem>>, %arg8: memref<3x32x32xf32, #tpu.memory_space<vmem>>, %arg9: memref<3x32xf32, #tpu.memory_space<vmem>>, %arg10: memref<3x32xf32, #tpu.memory_space<vmem>>, %arg11: memref<3x1xf32, #tpu.memory_space<vmem>>, %arg12: memref<32x32xf32, #tpu.memory_space<vmem>>, %arg13: memref<1x32xf32, #tpu.memory_space<vmem>>, %arg14: memref<1x32x256xf32, #tpu.memory_space<vmem>>) attributes {dimension_semantics = [#tpu.dimension_semantics<parallel>], iteration_bounds = array<i64: 2>, scalar_prefetch = 0 : i64, scratch_operands = 0 : i64, tpu.core_type = #tpu.core_type<tc>, window_params = [{transform_indices = @transform_0, window_bounds = array<i64: 1, 32, 256>}, {pipeline_mode = #tpu.pipeline_mode<synchronous>, transform_indices = @transform_1, window_bounds = array<i64: 16, 64>}, {pipeline_mode = #tpu.pipeline_mode<synchronous>, transform_indices = @transform_2, window_bounds = array<i64: 16, 256>}, {pipeline_mode = #tpu.pipeline_mode<synchronous>, transform_indices = @transform_3, window_bounds = array<i64: 16, 32>}, {pipeline_mode = #tpu.pipeline_mode<synchronous>, transform_indices = @transform_4, window_bounds = array<i64: 16, 32>}, {pipeline_mode = #tpu.pipeline_mode<synchronous>, transform_indices = @transform_5, window_bounds = array<i64: 3, 32, 32>}, {pipeline_mode = #tpu.pipeline_mode<synchronous>, transform_indices = @transform_6, window_bounds = array<i64: 3, 32>}, {pipeline_mode = #tpu.pipeline_mode<synchronous>, transform_indices = @transform_7, window_bounds = array<i64: 3, 32, 32>}, {pipeline_mode = #tpu.pipeline_mode<synchronous>, transform_indices = @transform_8, window_bounds = array<i64: 3, 32>}, {pipeline_mode = #tpu.pipeline_mode<synchronous>, transform_indices = @transform_9, window_bounds = array<i64: 3, 32>}, {pipeline_mode = #tpu.pipeline_mode<synchronous>, transform_indices = @transform_10, window_bounds = array<i64: 3, 1>}, {pipeline_mode = #tpu.pipeline_mode<synchronous>, transform_indices = @transform_11, window_bounds = array<i64: 32, 32>}, {pipeline_mode = #tpu.pipeline_mode<synchronous>, transform_indices = @transform_12, window_bounds = array<i64: 1, 32>}, {transform_indices = @transform_13, window_bounds = array<i64: 1, 32, 256>}]} {
    %c0 = arith.constant 0 : index
    %c0_0 = arith.constant 0 : index
    %c0_1 = arith.constant 0 : index
    %0 = vector.load %arg1[%c0, %c0_0, %c0_1] : memref<1x32x256xf32, #tpu.memory_space<vmem>>, vector<1x32x256xf32>
    %1 = vector.shape_cast %0 : vector<1x32x256xf32> to vector<32x256xf32>
    %2 = arith.truncf %1 : vector<32x256xf32> to vector<32x256xbf16>
    %3 = arith.mulf %1, %1 : vector<32x256xf32>
    %4 = arith.truncf %3 : vector<32x256xf32> to vector<32x256xbf16>
    %5 = tpu.concatenate %4, %2 in 0 : vector<32x256xbf16>, vector<32x256xbf16> -> vector<64x256xbf16>
    %c0_2 = arith.constant 0 : index
    %c0_3 = arith.constant 0 : index
    %6 = vector.load %arg2[%c0_2, %c0_3] : memref<16x64xbf16, #tpu.memory_space<vmem>>, vector<16x64xbf16>
    %cst = arith.constant dense<0.000000e+00> : vector<16x256xf32>
    %7 = tpu.matmul %6, %5, %cst {dimension_numbers = #tpu.dot_dimension_numbers<[1], [0], [0], [1], [0, 0, 1, 1], [], []>} : vector<16x64xbf16>, vector<64x256xbf16>, vector<16x256xf32> -> vector<16x256xf32>
    %c0_4 = arith.constant 0 : index
    %c0_5 = arith.constant 0 : index
    %8 = vector.load %arg3[%c0_4, %c0_5] : memref<16x256xf32, #tpu.memory_space<vmem>>, vector<16x256xf32>
    %9 = arith.addf %7, %8 : vector<16x256xf32>
    %cst_6 = arith.constant dense<0xFF800000> : vector<256xf32>
    %10 = vector.multi_reduction <maximumf>, %9, %cst_6 [0] : vector<16x256xf32> to vector<256xf32>
    %11 = vector.shape_cast %10 : vector<256xf32> to vector<1x256xf32>
    %12 = vector.broadcast %11 : vector<1x256xf32> to vector<16x256xf32>
    %13 = arith.subf %9, %12 : vector<16x256xf32>
    %14 = math.exp %13 : vector<16x256xf32>
    %cst_7 = arith.constant dense<0.000000e+00> : vector<256xf32>
    %15 = vector.multi_reduction <add>, %14, %cst_7 [0] : vector<16x256xf32> to vector<256xf32>
    %16 = vector.shape_cast %15 : vector<256xf32> to vector<1x256xf32>
    %17 = tpu.reciprocal %16 {approx = true} : vector<1x256xf32> -> vector<1x256xf32>
    %18 = vector.broadcast %17 : vector<1x256xf32> to vector<16x256xf32>
    %19 = arith.mulf %14, %18 : vector<16x256xf32>
    %cst_8 = arith.constant dense<0.000000e+00> : vector<16xf32>
    %20 = vector.multi_reduction <add>, %19, %cst_8 [1] : vector<16x256xf32> to vector<16xf32>
    %21 = vector.shape_cast %20 : vector<16xf32> to vector<16x1xf32>
    %22 = arith.truncf %19 : vector<16x256xf32> to vector<16x256xbf16>
    %cst_9 = arith.constant dense<0.000000e+00> : vector<16x32xf32>
    %23 = tpu.matmul %22, %2, %cst_9 {dimension_numbers = #tpu.dot_dimension_numbers<[1], [1], [0], [0], [0, 0, 1, 0], [], []>} : vector<16x256xbf16>, vector<32x256xbf16>, vector<16x32xf32> -> vector<16x32xf32>
    %c0_10 = arith.constant 0 : index
    %c0_11 = arith.constant 0 : index
    %24 = vector.load %arg4[%c0_10, %c0_11] : memref<16x32xf32, #tpu.memory_space<vmem>>, vector<16x32xf32>
    %25 = arith.mulf %23, %24 : vector<16x32xf32>
    %c0_12 = arith.constant 0 : index
    %c0_13 = arith.constant 0 : index
    %26 = vector.load %arg5[%c0_12, %c0_13] : memref<16x32xf32, #tpu.memory_space<vmem>>, vector<16x32xf32>
    %27 = vector.broadcast %21 : vector<16x1xf32> to vector<16x32xf32>
    %28 = arith.mulf %26, %27 : vector<16x32xf32>
    %29 = arith.subf %25, %28 : vector<16x32xf32>
    %cst_14 = arith.constant 9.99999971E-10 : f32
    %30 = vector.broadcast %cst_14 : f32 to vector<16x1xf32>
    %31 = arith.addf %21, %30 : vector<16x1xf32>
    %32 = tpu.reciprocal %31 {approx = true} : vector<16x1xf32> -> vector<16x1xf32>
    %33 = vector.broadcast %32 : vector<16x1xf32> to vector<16x32xf32>
    %34 = arith.mulf %29, %33 : vector<16x32xf32>
    %35 = arith.mulf %34, %34 : vector<16x32xf32>
    %cst_15 = arith.constant dense<0.000000e+00> : vector<16xf32>
    %36 = vector.multi_reduction <add>, %35, %cst_15 [1] : vector<16x32xf32> to vector<16xf32>
    %37 = vector.shape_cast %36 : vector<16xf32> to vector<16x1xf32>
    %38 = math.sqrt %37 : vector<16x1xf32>
    %cst_16 = arith.constant 9.99999996E-13 : f32
    %39 = vector.broadcast %cst_16 : f32 to vector<16x1xf32>
    %40 = arith.maximumf %38, %39 : vector<16x1xf32>
    %41 = vector.broadcast %40 : vector<16x1xf32> to vector<16x32xf32>
    %42 = arith.divf %34, %41 : vector<16x32xf32>
    %43 = arith.mulf %42, %42 : vector<16x32xf32>
    %cst_17 = arith.constant dense<0.000000e+00> : vector<16xf32>
    %44 = vector.multi_reduction <add>, %43, %cst_17 [1] : vector<16x32xf32> to vector<16xf32>
    %45 = vector.shape_cast %44 : vector<16xf32> to vector<16x1xf32>
    %cst_18 = arith.constant dense<0.000000e+00> : vector<1xf32>
    %46 = vector.multi_reduction <add>, %45, %cst_18 [0] : vector<16x1xf32> to vector<1xf32>
    %47 = vector.shape_cast %46 : vector<1xf32> to vector<1x1xf32>
    %48 = math.sqrt %47 : vector<1x1xf32>
    %cst_19 = arith.constant 9.99999996E-13 : f32
    %49 = vector.broadcast %cst_19 : f32 to vector<1x1xf32>
    %50 = arith.maximumf %48, %49 : vector<1x1xf32>
    %51 = vector.broadcast %50 : vector<1x1xf32> to vector<16x32xf32>
    %52 = arith.divf %42, %51 : vector<16x32xf32>
    %53 = arith.mulf %52, %52 : vector<16x32xf32>
    %cst_20 = arith.constant dense<0.000000e+00> : vector<16xf32>
    %54 = vector.multi_reduction <add>, %53, %cst_20 [1] : vector<16x32xf32> to vector<16xf32>
    %55 = vector.shape_cast %54 : vector<16xf32> to vector<16x1xf32>
    %56 = math.sqrt %55 : vector<16x1xf32>
    %cst_21 = arith.constant 9.99999996E-13 : f32
    %57 = vector.broadcast %cst_21 : f32 to vector<16x1xf32>
    %58 = arith.maximumf %56, %57 : vector<16x1xf32>
    %59 = vector.broadcast %58 : vector<16x1xf32> to vector<16x32xf32>
    %60 = arith.divf %52, %59 : vector<16x32xf32>
    %cst_22 = arith.constant 0.000000e+00 : f32
    %61 = vector.broadcast %cst_22 : f32 to vector<16x32xf32>
    %62 = arith.maximumf %60, %61 : vector<16x32xf32>
    %cst_23 = arith.constant dense<0xFF800000> : vector<32xf32>
    %63 = vector.multi_reduction <maximumf>, %62, %cst_23 [0] : vector<16x32xf32> to vector<32xf32>
    %64 = vector.shape_cast %63 : vector<32xf32> to vector<1x32xf32>
    %65 = vector.shape_cast %64 : vector<1x32xf32> to vector<1x32x1xf32>
    %c0_24 = arith.constant 0 : index
    %c0_25 = arith.constant 0 : index
    %c0_26 = arith.constant 0 : index
    %66 = vector.load %arg6[%c0_24, %c0_25, %c0_26] : memref<3x32x32xf32, #tpu.memory_space<vmem>>, vector<3x32x32xf32>
    %67 = vector.broadcast %65 : vector<1x32x1xf32> to vector<3x32x32xf32>
    %68 = arith.mulf %67, %66 : vector<3x32x32xf32>
    %cst_27 = arith.constant dense<0.000000e+00> : vector<3x32xf32>
    %69 = vector.multi_reduction <add>, %68, %cst_27 [1] : vector<3x32x32xf32> to vector<3x32xf32>
    %c0_28 = arith.constant 0 : index
    %c0_29 = arith.constant 0 : index
    %70 = vector.load %arg7[%c0_28, %c0_29] : memref<3x32xf32, #tpu.memory_space<vmem>>, vector<3x32xf32>
    %71 = arith.addf %69, %70 : vector<3x32xf32>
    %cst_30 = arith.constant 0.000000e+00 : f32
    %72 = vector.broadcast %cst_30 : f32 to vector<3x32xf32>
    %73 = arith.maximumf %71, %72 : vector<3x32xf32>
    %74 = vector.shape_cast %73 : vector<3x32xf32> to vector<3x32x1xf32>
    %c0_31 = arith.constant 0 : index
    %c0_32 = arith.constant 0 : index
    %c0_33 = arith.constant 0 : index
    %75 = vector.load %arg8[%c0_31, %c0_32, %c0_33] : memref<3x32x32xf32, #tpu.memory_space<vmem>>, vector<3x32x32xf32>
    %76 = vector.broadcast %74 : vector<3x32x1xf32> to vector<3x32x32xf32>
    %77 = arith.mulf %76, %75 : vector<3x32x32xf32>
    %cst_34 = arith.constant dense<0.000000e+00> : vector<3x32xf32>
    %78 = vector.multi_reduction <add>, %77, %cst_34 [1] : vector<3x32x32xf32> to vector<3x32xf32>
    %c0_35 = arith.constant 0 : index
    %c0_36 = arith.constant 0 : index
    %79 = vector.load %arg9[%c0_35, %c0_36] : memref<3x32xf32, #tpu.memory_space<vmem>>, vector<3x32xf32>
    %80 = arith.addf %78, %79 : vector<3x32xf32>
    %cst_37 = arith.constant 0.000000e+00 : f32
    %81 = vector.broadcast %cst_37 : f32 to vector<3x32xf32>
    %82 = arith.subf %81, %80 : vector<3x32xf32>
    %83 = math.exp %82 : vector<3x32xf32>
    %cst_38 = arith.constant 1.000000e+00 : f32
    %84 = vector.broadcast %cst_38 : f32 to vector<3x32xf32>
    %85 = arith.addf %84, %83 : vector<3x32xf32>
    %cst_39 = arith.constant 1.000000e+00 : f32
    %86 = vector.broadcast %cst_39 : f32 to vector<3x32xf32>
    %87 = arith.divf %86, %85 : vector<3x32xf32>
    %c0_40 = arith.constant 0 : index
    %c0_41 = arith.constant 0 : index
    %88 = vector.load %arg10[%c0_40, %c0_41] : memref<3x32xf32, #tpu.memory_space<vmem>>, vector<3x32xf32>
    %89 = arith.mulf %87, %88 : vector<3x32xf32>
    %cst_42 = arith.constant dense<0.000000e+00> : vector<3xf32>
    %90 = vector.multi_reduction <add>, %89, %cst_42 [1] : vector<3x32xf32> to vector<3xf32>
    %91 = vector.shape_cast %90 : vector<3xf32> to vector<3x1xf32>
    %c0_43 = arith.constant 0 : index
    %c0_44 = arith.constant 0 : index
    %92 = vector.load %arg11[%c0_43, %c0_44] : memref<3x1xf32, #tpu.memory_space<vmem>>, vector<3x1xf32>
    %93 = arith.addf %91, %92 : vector<3x1xf32>
    %cst_45 = arith.constant dense<0xFF800000> : vector<1xf32>
    %94 = vector.multi_reduction <maximumf>, %93, %cst_45 [0] : vector<3x1xf32> to vector<1xf32>
    %95 = vector.shape_cast %94 : vector<1xf32> to vector<1x1xf32>
    %96 = vector.broadcast %95 : vector<1x1xf32> to vector<3x1xf32>
    %97 = arith.subf %93, %96 : vector<3x1xf32>
    %98 = math.exp %97 : vector<3x1xf32>
    %cst_46 = arith.constant dense<0.000000e+00> : vector<1xf32>
    %99 = vector.multi_reduction <add>, %98, %cst_46 [0] : vector<3x1xf32> to vector<1xf32>
    %100 = vector.shape_cast %99 : vector<1xf32> to vector<1x1xf32>
    %101 = tpu.reciprocal %100 {approx = true} : vector<1x1xf32> -> vector<1x1xf32>
    %102 = vector.broadcast %101 : vector<1x1xf32> to vector<3x1xf32>
    %103 = arith.mulf %98, %102 : vector<3x1xf32>
    %104 = vector.broadcast %103 : vector<3x1xf32> to vector<3x32xf32>
    %105 = arith.mulf %104, %87 : vector<3x32xf32>
    %cst_47 = arith.constant dense<0.000000e+00> : vector<32xf32>
    %106 = vector.multi_reduction <add>, %105, %cst_47 [0] : vector<3x32xf32> to vector<32xf32>
    %107 = vector.shape_cast %106 : vector<32xf32> to vector<1x32xf32>
    %108 = vector.broadcast %107 : vector<1x32xf32> to vector<16x32xf32>
    %109 = arith.mulf %108, %62 : vector<16x32xf32>
    %c0_48 = arith.constant 0 : index
    %c0_49 = arith.constant 0 : index
    %110 = vector.load %arg12[%c0_48, %c0_49] : memref<32x32xf32, #tpu.memory_space<vmem>>, vector<32x32xf32>
    %cst_50 = arith.constant dense<0.000000e+00> : vector<16x32xf32>
    %111 = tpu.matmul %109, %110, %cst_50 {dimension_numbers = #tpu.dot_dimension_numbers<[1], [0], [0], [1], [0, 0, 1, 1], [], []>} : vector<16x32xf32>, vector<32x32xf32>, vector<16x32xf32> -> vector<16x32xf32>
    %c0_51 = arith.constant 0 : index
    %c0_52 = arith.constant 0 : index
    %112 = vector.load %arg13[%c0_51, %c0_52] : memref<1x32xf32, #tpu.memory_space<vmem>>, vector<1x32xf32>
    %113 = vector.broadcast %112 : vector<1x32xf32> to vector<16x32xf32>
    %114 = arith.addf %111, %113 : vector<16x32xf32>
    %115 = arith.truncf %114 : vector<16x32xf32> to vector<16x32xbf16>
    %cst_53 = arith.constant dense<0.000000e+00> : vector<32x256xf32>
    %116 = tpu.matmul %115, %22, %cst_53 {dimension_numbers = #tpu.dot_dimension_numbers<[0], [0], [1], [1], [0, 1, 1, 1], [], []>} : vector<16x32xbf16>, vector<16x256xbf16>, vector<32x256xf32> -> vector<32x256xf32>
    %117 = arith.addf %116, %1 : vector<32x256xf32>
    %c0_54 = arith.constant 0 : index
    %c0_55 = arith.constant 0 : index
    %c0_56 = arith.constant 0 : index
    %118 = vector.load %arg14[%c0_54, %c0_55, %c0_56] : memref<1x32x256xf32, #tpu.memory_space<vmem>>, vector<1x32x256xf32>
    %119 = vector.shape_cast %118 : vector<1x32x256xf32> to vector<32x256xf32>
    %120 = vector.shape_cast %117 : vector<32x256xf32> to vector<1x32x256xf32>
    tpu.vector_store %arg14[%c0_54, %c0_55, %c0_56], %120 {strides = array<i32>} : memref<1x32x256xf32, #tpu.memory_space<vmem>>, vector<1x32x256xf32>,
    return
  }
  func.func @transform_0(%arg0: i32) -> (i32, i32, i32) {
    %c0_i32 = arith.constant 0 : i32
    %c0_i32_0 = arith.constant 0 : i32
    %c0_i32_1 = arith.constant 0 : i32
    return %arg0, %c0_i32, %c0_i32_0 : i32, i32, i32
  }
  func.func @transform_1(%arg0: i32) -> (i32, i32) {
    %c0_i32 = arith.constant 0 : i32
    %c0_i32_0 = arith.constant 0 : i32
    %c0_i32_1 = arith.constant 0 : i32
    return %c0_i32, %c0_i32_0 : i32, i32
  }
  func.func @transform_2(%arg0: i32) -> (i32, i32) {
    %c0_i32 = arith.constant 0 : i32
    %c0_i32_0 = arith.constant 0 : i32
    %c0_i32_1 = arith.constant 0 : i32
    return %c0_i32, %c0_i32_0 : i32, i32
  }
  func.func @transform_3(%arg0: i32) -> (i32, i32) {
    %c0_i32 = arith.constant 0 : i32
    %c0_i32_0 = arith.constant 0 : i32
    %c0_i32_1 = arith.constant 0 : i32
    return %c0_i32, %c0_i32_0 : i32, i32
  }
  func.func @transform_4(%arg0: i32) -> (i32, i32) {
    %c0_i32 = arith.constant 0 : i32
    %c0_i32_0 = arith.constant 0 : i32
    %c0_i32_1 = arith.constant 0 : i32
    return %c0_i32, %c0_i32_0 : i32, i32
  }
  func.func @transform_5(%arg0: i32) -> (i32, i32, i32) {
    %c0_i32 = arith.constant 0 : i32
    %c0_i32_0 = arith.constant 0 : i32
    %c0_i32_1 = arith.constant 0 : i32
    %c0_i32_2 = arith.constant 0 : i32
    return %c0_i32, %c0_i32_0, %c0_i32_1 : i32, i32, i32
  }
  func.func @transform_6(%arg0: i32) -> (i32, i32) {
    %c0_i32 = arith.constant 0 : i32
    %c0_i32_0 = arith.constant 0 : i32
    %c0_i32_1 = arith.constant 0 : i32
    return %c0_i32, %c0_i32_0 : i32, i32
  }
  func.func @transform_7(%arg0: i32) -> (i32, i32, i32) {
    %c0_i32 = arith.constant 0 : i32
    %c0_i32_0 = arith.constant 0 : i32
    %c0_i32_1 = arith.constant 0 : i32
    %c0_i32_2 = arith.constant 0 : i32
    return %c0_i32, %c0_i32_0, %c0_i32_1 : i32, i32, i32
  }
  func.func @transform_8(%arg0: i32) -> (i32, i32) {
    %c0_i32 = arith.constant 0 : i32
    %c0_i32_0 = arith.constant 0 : i32
    %c0_i32_1 = arith.constant 0 : i32
    return %c0_i32, %c0_i32_0 : i32, i32
  }
  func.func @transform_9(%arg0: i32) -> (i32, i32) {
    %c0_i32 = arith.constant 0 : i32
    %c0_i32_0 = arith.constant 0 : i32
    %c0_i32_1 = arith.constant 0 : i32
    return %c0_i32, %c0_i32_0 : i32, i32
  }
  func.func @transform_10(%arg0: i32) -> (i32, i32) {
    %c0_i32 = arith.constant 0 : i32
    %c0_i32_0 = arith.constant 0 : i32
    %c0_i32_1 = arith.constant 0 : i32
    return %c0_i32, %c0_i32_0 : i32, i32
  }
  func.func @transform_11(%arg0: i32) -> (i32, i32) {
    %c0_i32 = arith.constant 0 : i32
    %c0_i32_0 = arith.constant 0 : i32
    %c0_i32_1 = arith.constant 0 : i32
    return %c0_i32, %c0_i32_0 : i32, i32
  }
  func.func @transform_12(%arg0: i32) -> (i32, i32) {
    %c0_i32 = arith.constant 0 : i32
    %c0_i32_0 = arith.constant 0 : i32
    %c0_i32_1 = arith.constant 0 : i32
    return %c0_i32, %c0_i32_0 : i32, i32
  }
  func.func @transform_13(%arg0: i32) -> (i32, i32, i32) {
    %c0_i32 = arith.constant 0 : i32
    %c0_i32_0 = arith.constant 0 : i32
    %c0_i32_1 = arith.constant 0 : i32
    return %arg0, %c0_i32, %c0_i32_0 : i32, i32, i32
  }
}

</mosaic_0001>

<bundles_post_ra>
// kernel: graph_process_forward.1
= control target key start
LH: loop header
LB: loop body
LE: loop exit
PB: predicated region body
PF: predicated region fallthrough
CT: control target
= control target key end

     0   :  { %s1467_s25 = smov 0   ;;  %s1705_s0 = inlined_call_operand.vmem [shape: f32[2,32,256], index: 0, kind: input, shape index: {}]   ;;  %s1706_s1 = inlined_call_operand.vmem [shape: bf16[16,64], index: 1, kind: input, shape index: {}]   ;;  %s1707_s2 = inlined_call_operand.vmem [shape: f32[16,256], index: 2, kind: input, shape index: {}]   ;;  %s1708_s3 = inlined_call_operand.vmem [shape: f32[16,32], index: 3, kind: input, shape index: {}]   ;;  %s1709_s4 = inlined_call_operand.vmem [shape: f32[16,32], index: 4, kind: input, shape index: {}]   ;;  %s1710_s5 = inlined_call_operand.vmem [shape: f32[3,32,32], index: 5, kind: input, shape index: {}]   ;;  %s1711_s6 = inlined_call_operand.vmem [shape: f32[3,32], index: 6, kind: input, shape index: {}]   ;;  %s1712_s7 = inlined_call_operand.vmem [shape: f32[3,32,32], index: 7, kind: input, shape index: {}]   ;;  %s1713_s8 = inlined_call_operand.vmem [shape: f32[3,32], index: 8, kind: input, shape index: {}]   ;;  %s1714_s9 = inlined_call_operand.vmem [shape: f32[3,32], index: 9, kind: input, shape index: {}]   ;;  %s1715_s10 = inlined_call_operand.vmem [shape: f32[3,1], index: 10, kind: input, shape index: {}]   ;;  %s1716_s11 = inlined_call_operand.vmem [shape: f32[32,32], index: 11, kind: input, shape index: {}]   ;;  %s1717_s12 = inlined_call_operand.vmem [shape: f32[1,32], index: 12, kind: input, shape index: {}]   ;;  %s1718_s13 = inlined_call_operand.vmem [shape: f32[2,32,256], index: 13, kind: output, shape index: {}]  }
   0x1 LB: > { %s1269_s26 = sadd.s32 4294967295, %s1394_s25   ;;  %p1273_p0 = scmp.ge.s32.totalorder %s1394_s25, 1  ;;  %s1394_s25 = sphi %s1467_s25, %s23_s25  }
   0x2   : > { %p387_p1 = scmp.lt.s32.totalorder %s1394_s25, 3 }
   0x4   : > { %p388_p2 = pnand %p1273_p0, %p387_p1 }
   0x5   : > { %p431_p3 = scmp.lt.s32.totalorder (!%p388_p2), %s1269_s26, 1  ;;  %v1396_v0 = vmov (!%p388_p2), 0   ;;  %v1327_v25 = vld [vmem:[%s1706_s1] sm:$0xff] (!%p388_p2)   ;;  %vm477_vm0 = vcmask (!%p388_p2), 523264   ;;  %v1038_v27 = vld [vmem:[%s1716_s11 + $0x8] sm:$0xff] (!%p388_p2)  ;;  %v1039_v28 = vld [vmem:[%s1716_s11 + $0x10] sm:$0xff] (!%p388_p2) }
   0x6   : > { %391 = sbr.rel (%p388_p2) target bundleno = 2316 (0x90c), region = 72  ;;  %513 = vmatprep.mubr.bf16.mxu0 (!%p388_p2), %v1396_v0  ;;  %1325 = vset.pattern.permute.xlu1 (!%p388_p2), %v1396_v0  ;;  %v1037_v26 = vld [vmem:[%s1716_s11] sm:$0xff] (!%p388_p2)  ;;  %v1040_v30 = vld [vmem:[%s1716_s11 + $0x18] sm:$0xff] (!%p388_p2)  ;;  %v470_v34 = vld [vmem:[%s1707_s2 + $0x10] sm:$0xff] (!%p388_p2)  ;;  %vm637_vm1 = vcmask (!%p388_p2), 261120   ;;  %vm982_vm12 = vcmask (!%p388_p2), 1041409  }
   0x7   : > { %1326 = vset.pattern.permute.xlu0 (!%p388_p2), %v1396_v0  ;;  %v1306_v29 = vpack.c.bf16 (!%p388_p2), %v1038_v27, %v1037_v26  ;;  %v1310_v31 = vpack.c.bf16 (!%p388_p2), %v1040_v30, %v1039_v28  ;;  %v468_v32 = vld [vmem:[%s1707_s2] sm:$0xff] (!%p388_p2)  ;;  %v469_v35 = vld [vmem:[%s1707_s2 + $0x8] sm:$0xff] (!%p388_p2)  ;;  %v471_v37 = vld [vmem:[%s1707_s2 + $0x18] sm:$0xff] (!%p388_p2)  ;;  %vm985_vm13 = vcmask (!%p388_p2), 1042434   ;;  %vm988_vm14 = vcmask (!%p388_p2), 256000  }
   0x8   : > { %vm994_vm15 = vcmask (!%p388_p2), 2048  }
   0xd   : > { %s1720_s26 = smov (!%p431_p3, %s1269_s26), 1 }
   0xe   : > { %s1287_s27 = sshll.u32 %s1720_s26, 6 }
   0xf   : > { %s1486_s30 = scalar_lea.vmem %s1705_s0, %s1287_s27  ;;  %s1684_s22 = scalar_lea.vmem %s1718_s13, %s1287_s27 }
  0x10   : > { %v443_v1 = vld [vmem:[%s1486_s30 + $0x8] sm:$0xff]  ;;  %v445_v2 = vld [vmem:[%s1486_s30 + $0x18] sm:$0xff]  ;;  %v442_v3 = vld [vmem:[%s1486_s30] sm:$0xff] }
  0x11   : > { %v455_v4 = vmul.f32 %v443_v1, %v443_v1  ;;  %v457_v5 = vmul.f32 %v445_v2, %v445_v2  ;;  %v444_v6 = vld [vmem:[%s1486_s30 + $0x10] sm:$0xff]  ;;  %v454_v7 = vmul.f32 %v442_v3, %v442_v3  ;;  %v447_v8 = vld [vmem:[%s1486_s30 + $0x28] sm:$0xff]  ;;  %v449_v9 = vld [vmem:[%s1486_s30 + $0x38] sm:$0xff]  ;;  %v451_v10 = vpack.c.bf16 %v445_v2, %v443_v1 }
  0x12   : > { %v456_v11 = vmul.f32 %v444_v6, %v444_v6  ;;  %v459_v12 = vmul.f32 %v447_v8, %v447_v8  ;;  %v461_v13 = vmul.f32 %v449_v9, %v449_v9  ;;  %v446_v14 = vld [vmem:[%s1486_s30 + $0x20] sm:$0xff]  ;;  %v448_v15 = vld [vmem:[%s1486_s30 + $0x30] sm:$0xff]  ;;  %v450_v16 = vpack.c.bf16 %v444_v6, %v442_v3 }
  0x13   : > { %v463_v17 = vpack.c.bf16 %v457_v5, %v455_v4  ;;  %v458_v18 = vmul.f32 %v446_v14, %v446_v14  ;;  %v460_v19 = vmul.f32 %v448_v15, %v448_v15  ;;  %v453_v20 = vpack.c.bf16 %v449_v9, %v447_v8  ;;  %578 = vmatprep.subr.bf16.mxu1 %v451_v10 }
  0x14   : > { %v462_v21 = vpack.c.bf16 %v456_v11, %v454_v7  ;;  %v465_v22 = vpack.c.bf16 %v461_v13, %v459_v12  ;;  %579 = vmatpush1.bf16.xpose.msra.mxu1 %v450_v16  ;;  %v452_v24 = vpack.c.bf16 %v448_v15, %v446_v14 }
  0x15   : > { %481 = vmatprep.subr.bf16.mxu0 %v463_v17  ;;  %580 = vmatprep.subr.bf16.mxu1 %v453_v20  ;;  %v464_v23 = vpack.c.bf16 %v460_v19, %v458_v18 }
  0x16   : > { %482 = vmatpush1.bf16.msra.mxu0 %v462_v21 }
  0x17   : > { %483 = vmatprep.subr.bf16.mxu0 %v465_v22 }
  0x1a   : > { %484 = vmatpush1.bf16.msra.mxu0 %v464_v23 }
  0x1b   : > { %485 = vmatprep.subr.bf16.mxu0 %v451_v10 }
  0x1c   : > { %581 = vmatpush1.bf16.xpose.msra.mxu1 %v452_v24 }
  0x1e   : > { %486 = vmatpush1.bf16.msra.mxu0 %v450_v16 }
  0x1f   : > { %487 = vmatprep.subr.bf16.mxu0 %v453_v20 }
  0x22   : > { %488 = vmatpush1.bf16.msra.mxu0 %v452_v24 }
  0x23   : > { %1307 = vmatprep.subr.bf16.mxu0 %v1306_v29 }
  0x25   : > { %1279 = vmatmul.mubr.msk.bf16.vlgmr.msra.gmra.mrb[0].mxu0 %vm477_vm0, %v1327_v25  ;;  %vm1146_vm0 = vcmask 130048  }
  0x26   : > { %1309 = vmatpush3.bf16.msra.mxu0 %v1306_v29 }
  0x27   : > { %1311 = vmatprep.subr.bf16.mxu0 %v1310_v31 }
  0x2a   : > { %1313 = vmatpush3.bf16.msra.mxu0 %v1310_v31 }
  0xf8   : > { %v515_v33 = vpop.f32.mrb[0].mxu0 }
  0xf9   : > { %v517_v36 = vpop.f32.mrb[1].mxu0  ;;  %v516_v39 = vadd.f32 %v515_v33, %v468_v32 }
  0xfa   : > { %v519_v38 = vpop.f32.mrb[2].mxu0  ;;  %v518_v42 = vadd.f32 %v517_v36, %v469_v35  ;;  %v623_v35 = vld [vmem:[%s1709_s4] sm:$0xff] }
  0xfb   : > { %v520_v40 = vadd.f32 %v519_v38, %v470_v34  ;;  %v521_v41 = vpop.f32.mrb[3].mxu0  ;;  %v619_v36 = vld [vmem:[%s1708_s3] sm:$0xff] }
  0xfc   : > { %v522_v43 = vadd.f32 %v521_v41, %v471_v37  ;;  %v624_v37 = vld [vmem:[%s1709_s4 + $0x8] sm:$0xff] }
  0xfd   : > { %v524_v44 = vmax.f32 %v516_v39, %v520_v40 }
  0xfe   : > { %v531_v45 = vmax.f32 %v518_v42, %v522_v43 }
  0xff   : > { %v525_v46 = vrot.slane %v524_v44, 4 }
 0x100   : > { %v532_v47 = vrot.slane %v531_v45, 4 }
 0x101   : > { %v526_v48 = vmax.f32 %v524_v44, %v525_v46 }
 0x102   : > { %v533_v49 = vmax.f32 %v531_v45, %v532_v47 }
 0x103   : > { %v527_v50 = vrot.slane %v526_v48, 2 }
 0x104   : > { %v534_v51 = vrot.slane %v533_v49, 2 }
 0x105   : > { %v528_v52 = vmax.f32 %v526_v48, %v527_v50 }
 0x106   : > { %v535_v53 = vmax.f32 %v533_v49, %v534_v51 }
 0x107   : > { %v529_v54 = vrot.slane %v528_v52, 1 }
 0x108   : > { %v536_v55 = vrot.slane %v535_v53, 1 }
 0x109   : > { %v530_v56 = vmax.f32 %v528_v52, %v529_v54 }
 0x10a   : > { %v537_v57 = vmax.f32 %v535_v53, %v536_v55 }
 0x10b   : > { %v538_v58 = vsub.f32 %v516_v39, %v530_v56  ;;  %v540_v59 = vsub.f32 %v520_v40, %v530_v56  ;;  %v620_v39 = vld [vmem:[%s1708_s3 + $0x8] sm:$0xff] }
 0x10c   : > { %v539_v60 = vsub.f32 %v518_v42, %v537_v57  ;;  %v541_v61 = vsub.f32 %v522_v43, %v537_v57 }
 0x10d   : > { %v542_v62 = vmul.f32 1.442695, %v538_v58  ;;  %v546_v63 = vmul.f32 1.442695, %v540_v59 }
 0x10e   : > { %v544_v1 = vmul.f32 1.442695, %v539_v60  ;;  %v548_v2 = vmul.f32 1.442695, %v541_v61 }
 0x10f   : > { %1328 = vpow2.f32 %v542_v62 }
 0x110   : > { %1330 = vpow2.f32 %v546_v63 }
 0x111   : > { %1332 = vpow2.f32 %v544_v1 }
 0x112   : > { %1334 = vpow2.f32 %v548_v2 }
 0x119   : > { %v1329_v3 = vpop.eup %1328 }
 0x11a   : > { %v1331_v4 = vpop.eup %1330 }
 0x11b   : > { %v1333_v5 = vpop.eup %1332  ;;  %v550_v6 = vadd.f32 %v1331_v4, %v1329_v3 }
 0x11c   : > { %v1335_v7 = vpop.eup %1334 }
 0x11d   : > { %v551_v8 = vrot.slane %v550_v6, 4  ;;  %v557_v9 = vadd.f32 %v1335_v7, %v1333_v5 }
 0x11f   : > { %v552_v10 = vadd.f32 %v551_v8, %v550_v6  ;;  %v558_v11 = vrot.slane %v557_v9, 4 }
 0x121   : > { %v559_v12 = vadd.f32 %v558_v11, %v557_v9  ;;  %v553_v13 = vrot.slane %v552_v10, 2 }
 0x123   : > { %v560_v14 = vrot.slane %v559_v12, 2  ;;  %v554_v15 = vadd.f32 %v553_v13, %v552_v10 }
 0x125   : > { %v561_v16 = vadd.f32 %v560_v14, %v559_v12  ;;  %v555_v17 = vrot.slane %v554_v15, 1 }
 0x127   : > { %v562_v18 = vrot.slane %v561_v16, 1  ;;  %v556_v19 = vadd.f32 %v555_v17, %v554_v15 }
 0x129   : > { %v563_v20 = vadd.f32 %v562_v18, %v561_v16  ;;  %1336 = vrcp.f32 %v556_v19 }
 0x12b   : > { %1338 = vrcp.f32 %v563_v20 }
 0x133   : > { %v1337_v21 = vpop.eup %1336 }
 0x134   : > { %v566_v22 = vmul.f32 %v1337_v21, %v1329_v3  ;;  %v568_v23 = vmul.f32 %v1337_v21, %v1331_v4 }
 0x135   : > { %v1339_v24 = vpop.eup %1338 }
 0x136   : > { %v567_v25 = vmul.f32 %v1339_v24, %v1333_v5  ;;  %v569_v26 = vmul.f32 %v1339_v24, %v1335_v7  ;;  %v1523_v27 = vpack.c.bf16 %v568_v23, %v566_v22 }
 0x138   : > { %v577_v28 = vpack.c.bf16 %v569_v26, %v567_v25  ;;  %v570_v29 = vadd.f32 %v567_v25, %v566_v22  ;;  %v573_v30 = vadd.f32 %v569_v26, %v568_v23 }
 0x13a   : > { %610 = vmatprep.mubr.bf16.mxu1 %v577_v28  ;;  %1153 = vmatprep.subr.bf16.mxu0 %v577_v28 }
 0x13b   : > { %1314 = vmatprep.subr.bf16.mxu1 %v577_v28  ;;  %571 = vadd.xlane.f32.xlu0 %v570_v29 }
 0x13c   : > { %611 = vmatmul.mubr.bf16.vlgmr.msra.gmra.mrb[0].mxu1 %v1523_v27 }
 0x13d   : > { %1315 = vmatpush1.bf16.msra.mxu1 %v1523_v27  ;;  %1195 = vmatprep.mubr.bf16.mxu1 %v1396_v0 }
 0x13f   : > { %574 = vadd.xlane.f32.xlu0 %v573_v30 }
 0x1c8   : > { %v572_v31 = vpop.xlane.xlu0 %571 }
 0x1c9   : > { %v629_v33 = vadd.f32 1e-09, %v572_v31  ;;  %v625_v40 = vmul.f32 %v623_v35, %v572_v31 }
 0x1cb   : > { %1340 = vrcp.f32 %v629_v33 }
 0x1cc   : > { %v575_v32 = vpop.xlane.xlu0 %574 }
 0x1cd   : > { %v630_v34 = vadd.f32 1e-09, %v575_v32  ;;  %v626_v44 = vmul.f32 %v624_v37, %v575_v32 }
 0x1cf   : > { %1342 = vrcp.f32 %v630_v34 }
 0x1d5   : > { %v1341_v48 = vpop.eup %1340 }
 0x1d9   : > { %v1343_v51 = vpop.eup %1342 }
 0x20f   : > { %v612_v38 = vpop.f32.mrb[0].mxu1 }
 0x210   : > { %v621_v41 = vmul.f32 %v619_v36, %v612_v38  ;;  %v614_v42 = vpop.f32.mrb[1].mxu1 }
 0x211   : > { %v615_v43 = vpop.f32.mrb[2].mxu1 }
 0x212   : > { %v627_v45 = vsub.f32 %v621_v41, %v625_v40  ;;  %v622_v46 = vmul.f32 %v620_v39, %v615_v43  ;;  %v617_v47 = vpop.f32.mrb[3].mxu1 }
 0x214   : > { %v628_v49 = vsub.f32 %v622_v46, %v626_v44  ;;  %v633_v50 = vmul.f32 %v1341_v48, %v627_v45 }
 0x216   : > { %v635_v52 = vmul.f32 %v633_v50, %v633_v50  ;;  %v634_v53 = vmul.f32 %v1343_v51, %v628_v49 }
 0x218   : > { %v638_v54 = vsel %vm637_vm1, %v635_v52, 0.0  ;;  %v636_v55 = vmul.f32 %v634_v53, %v634_v53 }
 0x219   : > { %639 = vadd.xlane.f32.xlu1 %v638_v54 }
 0x21a   : > { %v641_v56 = vsel %vm637_vm1, %v636_v55, 0.0 }
 0x21d   : > { %642 = vadd.xlane.f32.xlu1 %v641_v56 }
 0x2a6   : > { %v640_v57 = vpop.xlane.xlu1 %639 }
 0x2a7   : > { %1344 = vrsqrt.f32 %v640_v57  ;;  %vm646_vm2 = vcmp.eq.f32.partialorder %v640_v57, inf  ;;  %v649_v61 = vand.u32 2147483648, %v640_v57  ;;  %vm648_vm3 = vcmp.eq.f32.partialorder %v640_v57, 0.0 }
 0x2aa   : > { %v643_v58 = vpop.xlane.xlu1 %642 }
 0x2ab   : > { %1346 = vrsqrt.f32 %v643_v58  ;;  %vm653_vm4 = vcmp.eq.f32.partialorder %v643_v58, inf  ;;  %v656_v4 = vand.u32 2147483648, %v643_v58  ;;  %vm655_vm5 = vcmp.eq.f32.partialorder %v643_v58, 0.0 }
 0x2b1   : > { %v1345_v59 = vpop.eup %1344 }
 0x2b2   : > { %v645_v60 = vmul.f32 %v1345_v59, %v640_v57 }
 0x2b4   : > { %v647_v62 = vsel %vm646_vm2, %v640_v57, %v645_v60 }
 0x2b5   : > { %v1347_v63 = vpop.eup %1346  ;;  %v650_v1 = vsel %vm648_vm3, %v649_v61, %v647_v62 }
 0x2b6   : > { %v658_v2 = vmax.f32 %v650_v1, 1e-12  ;;  %v652_v3 = vmul.f32 %v1347_v63, %v643_v58 }
 0x2b8   : > { %1348 = vrcp.f32 %v658_v2  ;;  %v654_v5 = vsel %vm653_vm4, %v643_v58, %v652_v3 }
 0x2b9   : > { %v657_v6 = vsel %vm655_vm5, %v656_v4, %v654_v5  ;;  %v745_v5 = vld [vmem:[%s1710_s5 + $0x8] sm:$0xff] }
 0x2ba   : > { %v659_v7 = vmax.f32 %v657_v6, 1e-12  ;;  %v749_v6 = vld [vmem:[%s1710_s5 + $0x28] sm:$0xff] }
 0x2bc   : > { %1350 = vrcp.f32 %v659_v7  ;;  %v753_v7 = vld [vmem:[%s1710_s5 + $0x48] sm:$0xff] }
 0x2c2   : > { %v1349_v8 = vpop.eup %1348 }
 0x2c3   : > { %v661_v9 = vmul.f32 %v1349_v8, %v633_v50  ;;  %v744_v8 = vld [vmem:[%s1710_s5] sm:$0xff] }
 0x2c5   : > { %v664_v10 = vmul.f32 %v661_v9, %v661_v9 }
 0x2c6   : > { %v1351_v11 = vpop.eup %1350 }
 0x2c7   : > { %v666_v12 = vsel %vm637_vm1, %v664_v10, 0.0  ;;  %v663_v13 = vmul.f32 %v1351_v11, %v634_v53  ;;  %v752_v10 = vld [vmem:[%s1710_s5 + $0x40] sm:$0xff] }
 0x2c8   : > { %667 = vadd.xlane.f32.xlu0 %v666_v12 }
 0x2c9   : > { %v665_v14 = vmul.f32 %v663_v13, %v663_v13 }
 0x2cb   : > { %v669_v15 = vsel %vm637_vm1, %v665_v14, 0.0 }
 0x2cc   : > { %670 = vadd.xlane.f32.xlu1 %v669_v15 }
 0x355   : > { %v668_v16 = vpop.xlane.xlu0 %667 }
 0x359   : > { %v671_v17 = vpop.xlane.xlu1 %670 }
 0x35a   : > { %v672_v18 = vadd.f32 %v671_v17, %v668_v16 }
 0x35c   : > { %v673_v19 = vrot.slane %v672_v18, 4 }
 0x35e   : > { %v674_v20 = vadd.f32 %v673_v19, %v672_v18  ;;  %v746_v19 = vld [vmem:[%s1710_s5 + $0x10] sm:$0xff] }
 0x360   : > { %v675_v21 = vrot.slane %v674_v20, 2 }
 0x362   : > { %v676_v22 = vadd.f32 %v675_v21, %v674_v20  ;;  %v750_v20 = vld [vmem:[%s1710_s5 + $0x30] sm:$0xff] }
 0x363   : > { %v754_v21 = vld [vmem:[%s1710_s5 + $0x50] sm:$0xff] }
 0x364   : > { %v677_v23 = vrot.slane %v676_v22, 1 }
 0x366   : > { %v678_v24 = vadd.f32 %v677_v23, %v676_v22 }
 0x368   : > { %1352 = vrsqrt.f32 %v678_v24  ;;  %vm681_vm6 = vcmp.eq.f32.partialorder %v678_v24, inf  ;;  %v684_v28 = vand.u32 2147483648, %v678_v24  ;;  %vm683_vm7 = vcmp.eq.f32.partialorder %v678_v24, 0.0 }
 0x372   : > { %v1353_v25 = vpop.eup %1352 }
 0x373   : > { %v680_v26 = vmul.f32 %v1353_v25, %v678_v24 }
 0x375   : > { %v682_v29 = vsel %vm681_vm6, %v678_v24, %v680_v26 }
 0x376   : > { %v685_v30 = vsel %vm683_vm7, %v684_v28, %v682_v29 }
 0x377   : > { %v686_v31 = vmax.f32 %v685_v30, 1e-12 }
 0x379   : > { %1354 = vrcp.f32 %v686_v31 }
 0x383   : > { %v1355_v32 = vpop.eup %1354 }
 0x384   : > { %v689_v33 = vmul.f32 %v1355_v32, %v663_v13  ;;  %v688_v34 = vmul.f32 %v1355_v32, %v661_v9  ;;  %v748_v9 = vld [vmem:[%s1710_s5 + $0x20] sm:$0xff] }
 0x386   : > { %v691_v35 = vmul.f32 %v689_v33, %v689_v33  ;;  %v690_v36 = vmul.f32 %v688_v34, %v688_v34 }
 0x388   : > { %v695_v37 = vsel %vm637_vm1, %v691_v35, 0.0  ;;  %v692_v38 = vsel %vm637_vm1, %v690_v36, 0.0  ;;  %v755_v35 = vld [vmem:[%s1710_s5 + $0x58] sm:$0xff] }
 0x389   : > { %696 = vadd.xlane.f32.xlu1 %v695_v37  ;;  %693 = vadd.xlane.f32.xlu0 %v692_v38 }
 0x416   : > { %v697_v39 = vpop.xlane.xlu1 %696  ;;  %v694_v40 = vpop.xlane.xlu0 %693 }
 0x417   : > { %1356 = vrsqrt.f32 %v697_v39  ;;  %vm707_vm8 = vcmp.eq.f32.partialorder %v697_v39, inf  ;;  %v710_v44 = vand.u32 2147483648, %v697_v39  ;;  %vm709_vm9 = vcmp.eq.f32.partialorder %v697_v39, 0.0 }
 0x418   : > { %1358 = vrsqrt.f32 %v694_v40  ;;  %vm700_vm10 = vcmp.eq.f32.partialorder %v694_v40, inf  ;;  %v703_v47 = vand.u32 2147483648, %v694_v40  ;;  %vm702_vm11 = vcmp.eq.f32.partialorder %v694_v40, 0.0 }
 0x421   : > { %v1357_v41 = vpop.eup %1356 }
 0x422   : > { %v1359_v42 = vpop.eup %1358  ;;  %v706_v43 = vmul.f32 %v1357_v41, %v697_v39 }
 0x423   : > { %v699_v45 = vmul.f32 %v1359_v42, %v694_v40 }
 0x424   : > { %v708_v46 = vsel %vm707_vm8, %v697_v39, %v706_v43 }
 0x425   : > { %v711_v48 = vsel %vm709_vm9, %v710_v44, %v708_v46  ;;  %v701_v49 = vsel %vm700_vm10, %v694_v40, %v699_v45 }
 0x426   : > { %v713_v50 = vmax.f32 %v711_v48, 1e-12  ;;  %v704_v51 = vsel %vm702_vm11, %v703_v47, %v701_v49 }
 0x427   : > { %v712_v52 = vmax.f32 %v704_v51, 1e-12 }
 0x428   : > { %1360 = vrcp.f32 %v713_v50 }
 0x429   : > { %1362 = vrcp.f32 %v712_v52 }
 0x432   : > { %v1361_v53 = vpop.eup %1360 }
 0x433   : > { %v1363_v54 = vpop.eup %1362  ;;  %v1546_v55 = vmul.f32 %v1361_v53, %v689_v33  ;;  %v747_v33 = vld [vmem:[%s1710_s5 + $0x18] sm:$0xff] }
 0x434   : > { %v1548_v56 = vmul.f32 %v1363_v54, %v688_v34  ;;  %v751_v34 = vld [vmem:[%s1710_s5 + $0x38] sm:$0xff] }
 0x435   : > { %v719_v57 = vmax.f32 %v1546_v55, 0.0 }
 0x436   : > { %v718_v58 = vmax.f32 %v1548_v56, 0.0 }
 0x437   : > { %v721_v59 = vsel %vm637_vm1, %v719_v57, -inf }
 0x438   : > { %v720_v60 = vsel %vm637_vm1, %v718_v58, -inf }
 0x439   : > { %v722_v61 = vmax.f32 %v720_v60, %v721_v59 }
 0x43b   : > { %v723_v62 = vrot.slane %v722_v61, 4 }
 0x43d   : > { %v724_v63 = vmax.f32 %v722_v61, %v723_v62 }
 0x43f   : > { %v725_v1 = vrot.slane %v724_v63, 2 }
 0x441   : > { %v726_v2 = vmax.f32 %v724_v63, %v725_v1 }
 0x443   : > { %v727_v3 = vrot.slane %v726_v2, 1 }
 0x445   : > { %v728_v4 = vmax.f32 %v726_v2, %v727_v3 }
 0x447   : > { %734 = vbcast.lane.b32.xlu1 %v728_v4, 264  ;;  %730 = vbcast.lane.b32.xlu0 %v728_v4, 256 }
 0x44b   : > { %738 = vbcast.lane.b32.xlu1 %v728_v4, 272 }
 0x44f   : > { %742 = vbcast.lane.b32.xlu1 %v728_v4, 280 }
 0x4b9   : > { %v735_v11 = vpop.permute.xlu1 %734  ;;  %v731_v12 = vpop.permute.xlu0 %730 }
 0x4ba   : > { %v757_v13 = vmul.f32 %v745_v5, %v735_v11  ;;  %v761_v14 = vmul.f32 %v749_v6, %v735_v11  ;;  %v765_v15 = vmul.f32 %v753_v7, %v735_v11  ;;  %v756_v16 = vmul.f32 %v744_v8, %v731_v12  ;;  %v807_v5 = vld [vmem:[%s1711_s6] sm:$0x7] }
 0x4bb   : > { %v760_v17 = vmul.f32 %v748_v9, %v731_v12  ;;  %v764_v18 = vmul.f32 %v752_v10, %v731_v12  ;;  %v820_v6 = vlaneseq  ;;  %v809_v10 = vrot.slane %v807_v5, 1 }
 0x4bc   : > { %v769_v22 = vsel %vm637_vm1, %v757_v13, 0.0  ;;  %v782_v23 = vsel %vm637_vm1, %v761_v14, 0.0  ;;  %v795_v24 = vsel %vm637_vm1, %v765_v15, 0.0  ;;  %v768_v25 = vsel %vm637_vm1, %v756_v16, 0.0 }
 0x4bd   : > { %v739_v26 = vpop.permute.xlu1 %738  ;;  %v781_v28 = vsel %vm637_vm1, %v760_v17, 0.0  ;;  %v794_v29 = vsel %vm637_vm1, %v764_v18, 0.0  ;;  %v770_v38 = vadd.f32 %v769_v22, %v768_v25  ;;  %v810_v11 = vrot.slane %v807_v5, 2 }
 0x4be   : > { %v758_v30 = vmul.f32 %v746_v19, %v739_v26  ;;  %v762_v31 = vmul.f32 %v750_v20, %v739_v26  ;;  %v766_v32 = vmul.f32 %v754_v21, %v739_v26  ;;  %v783_v39 = vadd.f32 %v782_v23, %v781_v28 }
 0x4bf   : > { %v796_v40 = vadd.f32 %v795_v24, %v794_v29  ;;  %v821_v15 = vshrl.u32 %v820_v6, 7 }
 0x4c0   : > { %v771_v36 = vsel %vm637_vm1, %v758_v30, 0.0  ;;  %v784_v37 = vsel %vm637_vm1, %v762_v31, 0.0  ;;  %v797_v41 = vsel %vm637_vm1, %v766_v32, 0.0 }
 0x4c1   : > { %v743_v42 = vpop.permute.xlu1 %742  ;;  %v772_v46 = vadd.f32 %v771_v36, %v770_v38  ;;  %v785_v47 = vadd.f32 %v784_v37, %v783_v39  ;;  %v798_v48 = vadd.f32 %v797_v41, %v796_v40  ;;  %v822_v19 = vsub.s32 0, %v821_v15  ;;  %v886_v40 = vld [vmem:[%s1712_s7 + $0x48] sm:$0xff]  ;;  %v885_v41 = vld [vmem:[%s1712_s7 + $0x40] sm:$0xff] }
 0x4c2   : > { %v759_v43 = vmul.f32 %v747_v33, %v743_v42  ;;  %v763_v44 = vmul.f32 %v751_v34, %v743_v42  ;;  %v767_v45 = vmul.f32 %v755_v35, %v743_v42  ;;  %v882_v34 = vld [vmem:[%s1712_s7 + $0x28] sm:$0xff]  ;;  %v881_v35 = vld [vmem:[%s1712_s7 + $0x20] sm:$0xff] }
 0x4c3   : > { %v878_v42 = vld [vmem:[%s1712_s7 + $0x8] sm:$0xff] }
 0x4c4   : > { %v773_v49 = vsel %vm637_vm1, %v759_v43, 0.0  ;;  %v786_v50 = vsel %vm637_vm1, %v763_v44, 0.0  ;;  %v799_v51 = vsel %vm637_vm1, %v767_v45, 0.0  ;;  %v877_v43 = vld [vmem:[%s1712_s7] sm:$0xff]  ;;  %v883_v44 = vld [vmem:[%s1712_s7 + $0x30] sm:$0xff] }
 0x4c5   : > { %v774_v52 = vadd.f32 %v773_v49, %v772_v46  ;;  %v787_v53 = vadd.f32 %v786_v50, %v785_v47  ;;  %v800_v54 = vadd.f32 %v799_v51, %v798_v48  ;;  %v887_v48 = vld [vmem:[%s1712_s7 + $0x50] sm:$0xff] }
 0x4c7   : > { %v775_v59 = vrot.slane %v774_v52, 4  ;;  %v788_v60 = vrot.slane %v787_v53, 4  ;;  %v801_v61 = vrot.slane %v800_v54, 4 }
 0x4c9   : > { %v776_v62 = vadd.f32 %v775_v59, %v774_v52  ;;  %v789_v63 = vadd.f32 %v788_v60, %v787_v53  ;;  %v802_v1 = vadd.f32 %v801_v61, %v800_v54  ;;  %v884_v59 = vld [vmem:[%s1712_s7 + $0x38] sm:$0xff]  ;;  %v879_v60 = vld [vmem:[%s1712_s7 + $0x10] sm:$0xff] }
 0x4cb   : > { %v777_v2 = vrot.slane %v776_v62, 2  ;;  %v790_v3 = vrot.slane %v789_v63, 2  ;;  %v803_v4 = vrot.slane %v802_v1, 2 }
 0x4cd   : > { %v778_v7 = vadd.f32 %v777_v2, %v776_v62  ;;  %v791_v8 = vadd.f32 %v790_v3, %v789_v63  ;;  %v804_v9 = vadd.f32 %v803_v4, %v802_v1 }
 0x4cf   : > { %v779_v12 = vrot.slane %v778_v7, 1  ;;  %v792_v13 = vrot.slane %v791_v8, 1  ;;  %v805_v14 = vrot.slane %v804_v9, 1 }
 0x4d1   : > { %v793_v16 = vadd.f32 %v792_v13, %v791_v8  ;;  %v806_v17 = vadd.f32 %v805_v14, %v804_v9  ;;  %v780_v21 = vadd.f32 %v779_v12, %v778_v7 }
 0x4d3   : > { %v815_v18 = vadd.f32 %v809_v10, %v793_v16  ;;  %v816_v20 = vadd.f32 %v810_v11, %v806_v17  ;;  %v814_v25 = vadd.f32 %v807_v5, %v780_v21  ;;  %v880_v10 = vld [vmem:[%s1712_s7 + $0x18] sm:$0xff] }
 0x4d4   : > { %v888_v11 = vld [vmem:[%s1712_s7 + $0x58] sm:$0xff] }
 0x4d5   : > { %v818_v22 = vmax.f32 %v815_v18, 0.0  ;;  %v819_v24 = vmax.f32 %v816_v20, 0.0  ;;  %v817_v28 = vmax.f32 %v814_v25, 0.0 }
 0x4d7   : > { %v842_v23 = vrot.slane %v818_v22, %v822_v19  ;;  %v861_v26 = vrot.slane %v819_v24, %v822_v19  ;;  %v823_v29 = vrot.slane %v817_v28, %v822_v19 }
 0x4d9   : > { %848 = vbcast.lane.b32.xlu1 %v842_v23, 264  ;;  %844 = vbcast.lane.b32.xlu0 %v842_v23, 256 }
 0x4dd   : > { %867 = vbcast.lane.b32.xlu1 %v861_v26, 264  ;;  %863 = vbcast.lane.b32.xlu0 %v861_v26, 256 }
 0x4e1   : > { %829 = vbcast.lane.b32.xlu1 %v823_v29, 264  ;;  %825 = vbcast.lane.b32.xlu0 %v823_v29, 256 }
 0x4e5   : > { %871 = vbcast.lane.b32.xlu1 %v861_v26, 272  ;;  %852 = vbcast.lane.b32.xlu0 %v842_v23, 272 }
 0x4e9   : > { %856 = vbcast.lane.b32.xlu1 %v842_v23, 280  ;;  %833 = vbcast.lane.b32.xlu0 %v823_v29, 272 }
 0x4ed   : > { %837 = vbcast.lane.b32.xlu1 %v823_v29, 280  ;;  %875 = vbcast.lane.b32.xlu0 %v861_v26, 280 }
 0x54b   : > { %v849_v30 = vpop.permute.xlu1 %848  ;;  %v845_v31 = vpop.permute.xlu0 %844 }
 0x54c   : > { %v894_v36 = vmul.f32 %v882_v34, %v849_v30  ;;  %v893_v39 = vmul.f32 %v881_v35, %v845_v31  ;;  %v940_v34 = vld [vmem:[%s1713_s8] sm:$0x7] }
 0x54e   : > { %v915_v45 = vsel %vm637_vm1, %v894_v36, 0.0  ;;  %v914_v51 = vsel %vm637_vm1, %v893_v39, 0.0 }
 0x54f   : > { %v868_v32 = vpop.permute.xlu1 %867  ;;  %v864_v33 = vpop.permute.xlu0 %863  ;;  %v916_v63 = vadd.f32 %v915_v45, %v914_v51 }
 0x550   : > { %v898_v46 = vmul.f32 %v886_v40, %v868_v32  ;;  %v897_v47 = vmul.f32 %v885_v41, %v864_v33 }
 0x552   : > { %v928_v1 = vsel %vm637_vm1, %v898_v46, 0.0  ;;  %v927_v2 = vsel %vm637_vm1, %v897_v47, 0.0  ;;  %v943_v47 = vrot.slane %v940_v34, 2 }
 0x553   : > { %v830_v37 = vpop.permute.xlu1 %829  ;;  %v826_v38 = vpop.permute.xlu0 %825  ;;  %v929_v15 = vadd.f32 %v928_v1, %v927_v2 }
 0x554   : > { %v890_v52 = vmul.f32 %v878_v42, %v830_v37  ;;  %v889_v53 = vmul.f32 %v877_v43, %v826_v38  ;;  %v942_v38 = vrot.slane %v940_v34, 1 }
 0x556   : > { %v902_v5 = vsel %vm637_vm1, %v890_v52, 0.0  ;;  %v901_v6 = vsel %vm637_vm1, %v889_v53, 0.0 }
 0x557   : > { %v872_v49 = vpop.permute.xlu1 %871  ;;  %v853_v50 = vpop.permute.xlu0 %852  ;;  %v903_v16 = vadd.f32 %v902_v5, %v901_v6  ;;  %v968_v6 = vld [vmem:[%s1714_s9] sm:$0x7] }
 0x558   : > { %v895_v54 = vmul.f32 %v883_v44, %v853_v50  ;;  %v899_v61 = vmul.f32 %v887_v48, %v872_v49 }
 0x55a   : > { %v917_v62 = vsel %vm637_vm1, %v895_v54, 0.0  ;;  %v930_v12 = vsel %vm637_vm1, %v899_v61, 0.0 }
 0x55b   : > { %v857_v3 = vpop.permute.xlu1 %856  ;;  %v834_v4 = vpop.permute.xlu0 %833  ;;  %v918_v9 = vadd.f32 %v917_v62, %v916_v63  ;;  %v931_v22 = vadd.f32 %v930_v12, %v929_v15 }
 0x55c   : > { %v896_v7 = vmul.f32 %v884_v59, %v857_v3  ;;  %v891_v8 = vmul.f32 %v879_v60, %v834_v4 }
 0x55e   : > { %v919_v13 = vsel %vm637_vm1, %v896_v7, 0.0  ;;  %v904_v14 = vsel %vm637_vm1, %v891_v8, 0.0  ;;  %v970_v7 = vrot.slane %v968_v6, 1 }
 0x55f   : > { %v920_v17 = vadd.f32 %v919_v13, %v918_v9  ;;  %v838_v18 = vpop.permute.xlu1 %837  ;;  %v876_v19 = vpop.permute.xlu0 %875  ;;  %v905_v24 = vadd.f32 %v904_v14, %v903_v16 }
 0x560   : > { %v892_v20 = vmul.f32 %v880_v10, %v838_v18  ;;  %v900_v21 = vmul.f32 %v888_v11, %v876_v19  ;;  %v971_v10 = vrot.slane %v968_v6, 2 }
 0x561   : > { %v921_v23 = vrot.slane %v920_v17, 4 }
 0x562   : > { %v906_v25 = vsel %vm637_vm1, %v892_v20, 0.0  ;;  %v932_v26 = vsel %vm637_vm1, %v900_v21, 0.0 }
 0x563   : > { %v922_v28 = vadd.f32 %v921_v23, %v920_v17  ;;  %v907_v29 = vadd.f32 %v906_v25, %v905_v24  ;;  %v933_v30 = vadd.f32 %v932_v26, %v931_v22  ;;  %v992_v24 = vld [vmem:[%s1715_s10] sm:$0x7] }
 0x565   : > { %v923_v31 = vrot.slane %v922_v28, 2  ;;  %v908_v32 = vrot.slane %v907_v29, 4  ;;  %v934_v33 = vrot.slane %v933_v30, 4 }
 0x567   : > { %v924_v35 = vadd.f32 %v923_v31, %v922_v28  ;;  %v909_v36 = vadd.f32 %v908_v32, %v907_v29  ;;  %v935_v37 = vadd.f32 %v934_v33, %v933_v30 }
 0x569   : > { %v925_v39 = vrot.slane %v924_v35, 1  ;;  %v910_v40 = vrot.slane %v909_v36, 2  ;;  %v936_v41 = vrot.slane %v935_v37, 2 }
 0x56b   : > { %v926_v42 = vadd.f32 %v925_v39, %v924_v35  ;;  %v911_v43 = vadd.f32 %v910_v40, %v909_v36  ;;  %v937_v44 = vadd.f32 %v936_v41, %v935_v37 }
 0x56d   : > { %v948_v45 = vadd.f32 %v942_v38, %v926_v42  ;;  %v912_v46 = vrot.slane %v911_v43, 1  ;;  %v938_v48 = vrot.slane %v937_v44, 1 }
 0x56f   : > { %v951_v49 = vsub.f32 0.0, %v948_v45  ;;  %v913_v50 = vadd.f32 %v912_v46, %v911_v43  ;;  %v939_v51 = vadd.f32 %v938_v48, %v937_v44 }
 0x571   : > { %v955_v52 = vmul.f32 1.442695, %v951_v49  ;;  %v947_v53 = vadd.f32 %v940_v34, %v913_v50  ;;  %v949_v54 = vadd.f32 %v943_v47, %v939_v51 }
 0x573   : > { %1364 = vpow2.f32 %v955_v52  ;;  %v950_v59 = vsub.f32 0.0, %v947_v53  ;;  %v952_v60 = vsub.f32 0.0, %v949_v54 }
 0x575   : > { %v953_v61 = vmul.f32 1.442695, %v950_v59  ;;  %v957_v62 = vmul.f32 1.442695, %v952_v60 }
 0x577   : > { %1366 = vpow2.f32 %v953_v61 }
 0x578   : > { %1368 = vpow2.f32 %v957_v62  ;;  %v1280_v62 = vld [vmem:[%s1717_s12] ss:$0 sm:$0xff] }
 0x57d   : > { %v1365_v63 = vpop.eup %1364 }
 0x57e   : > { %v960_v1 = vadd.f32 1.0, %v1365_v63 }
 0x580   : > { %1370 = vrcp.f32 %v960_v1 }
 0x581   : > { %v1367_v2 = vpop.eup %1366 }
 0x582   : > { %v1369_v3 = vpop.eup %1368  ;;  %v959_v4 = vadd.f32 1.0, %v1367_v2  ;;  %v1380_v2 = vld [vmem:[%s1486_s30] sm:$0xff] }
 0x583   : > { %v961_v5 = vadd.f32 1.0, %v1369_v3 }
 0x584   : > { %1372 = vrcp.f32 %v959_v4 }
 0x585   : > { %1374 = vrcp.f32 %v961_v5  ;;  %v1381_v5 = vld [vmem:[%s1486_s30 + $0x8] sm:$0xff] }
 0x58a   : > { %v1371_v8 = vpop.eup %1370 }
 0x58b   : > { %v976_v9 = vmul.f32 %v1371_v8, %v970_v7  ;;  %v1022_v11 = vrot.slane %v1371_v8, 7  ;;  %v1382_v8 = vld [vmem:[%s1486_s30 + $0x10] sm:$0xff] }
 0x58d   : > { %v981_v15 = vrot.slane %v976_v9, 7 }
 0x58e   : > { %v1373_v12 = vpop.eup %1372 }
 0x58f   : > { %v1375_v13 = vpop.eup %1374  ;;  %v975_v14 = vmul.f32 %v1373_v12, %v968_v6  ;;  %v1023_v16 = vsel %vm982_vm12, %v1022_v11, %v1373_v12  ;;  %v1383_v11 = vld [vmem:[%s1486_s30 + $0x18] sm:$0xff] }
 0x590   : > { %v977_v17 = vmul.f32 %v1375_v13, %v971_v10  ;;  %v1024_v18 = vrot.slane %v1375_v13, 6 }
 0x591   : > { %v983_v19 = vsel %vm982_vm12, %v981_v15, %v975_v14  ;;  %v1384_v14 = vld [vmem:[%s1486_s30 + $0x20] sm:$0xff] }
 0x592   : > { %v984_v20 = vrot.slane %v977_v17, 6  ;;  %v1025_v21 = vsel %vm985_vm13, %v1024_v18, %v1023_v16  ;;  %v1385_v17 = vld [vmem:[%s1486_s30 + $0x28] sm:$0xff] }
 0x594   : > { %v986_v22 = vsel %vm985_vm13, %v984_v20, %v983_v19  ;;  %v1386_v20 = vld [vmem:[%s1486_s30 + $0x30] sm:$0xff] }
 0x595   : > { %v989_v23 = vsel %vm988_vm14, %v986_v22, 0.0 }
 0x596   : > { %990 = vadd.xlane.f32.xlu0 %v989_v23  ;;  %v1387_v23 = vld [vmem:[%s1486_s30 + $0x38] sm:$0xff] }
 0x623   : > { %v991_v25 = vpop.xlane.xlu0 %990 }
 0x624   : > { %v993_v26 = vadd.f32 %v992_v24, %v991_v25 }
 0x626   : > { %v995_v28 = vsel %vm994_vm15, %v993_v26, -inf }
 0x627   : > { %v996_v29 = vrot.slane %v995_v28, 4 }
 0x629   : > { %v997_v30 = vmax.f32 %v995_v28, %v996_v29 }
 0x62b   : > { %v998_v31 = vrot.slane %v997_v30, 2 }
 0x62d   : > { %v999_v32 = vmax.f32 %v997_v30, %v998_v31 }
 0x62f   : > { %v1000_v33 = vrot.slane %v999_v32, 1 }
 0x631   : > { %v1001_v34 = vmax.f32 %v999_v32, %v1000_v33 }
 0x633   : > { %v1002_v35 = vsub.f32 %v993_v26, %v1001_v34 }
 0x635   : > { %v1003_v36 = vmul.f32 1.442695, %v1002_v35 }
 0x637   : > { %1376 = vpow2.f32 %v1003_v36 }
 0x641   : > { %v1377_v37 = vpop.eup %1376 }
 0x642   : > { %v1005_v38 = vsel %vm994_vm15, %v1377_v37, 0.0 }
 0x643   : > { %v1006_v39 = vrot.slane %v1005_v38, 4 }
 0x645   : > { %v1007_v40 = vadd.f32 %v1006_v39, %v1005_v38 }
 0x647   : > { %v1008_v41 = vrot.slane %v1007_v40, 2 }
 0x649   : > { %v1009_v42 = vadd.f32 %v1008_v41, %v1007_v40 }
 0x64b   : > { %v1010_v43 = vrot.slane %v1009_v42, 1 }
 0x64d   : > { %v1011_v44 = vadd.f32 %v1010_v43, %v1009_v42 }
 0x64f   : > { %1378 = vrcp.f32 %v1011_v44 }
 0x659   : > { %v1379_v45 = vpop.eup %1378 }
 0x65a   : > { %v1013_v46 = vmul.f32 %v1379_v45, %v1377_v37 }
 0x65c   : > { %1016 = vperm.xlu1 %1325, %v1013_v46  }
 0x6db   : > { %v1017_v47 = vpop.permute.xlu1 %1016 }
 0x6dc   : > { %v1027_v48 = vmul.f32 %v1025_v21, %v1017_v47 }
 0x6de   : > { %v1028_v49 = vsel %vm988_vm14, %v1027_v48, 0.0 }
 0x6df   : > { %v1029_v50 = vrot.slane %v1028_v49, 4 }
 0x6e1   : > { %v1030_v51 = vadd.f32 %v1029_v50, %v1028_v49 }
 0x6e3   : > { %v1031_v52 = vrot.slane %v1030_v51, 2 }
 0x6e5   : > { %v1032_v53 = vadd.f32 %v1031_v52, %v1030_v51 }
 0x6e7   : > { %v1033_v54 = vrot.slane %v1032_v53, 1 }
 0x6e9   : > { %v1034_v59 = vadd.f32 %v1033_v54, %v1032_v53 }
 0x6eb   : > { %v1036_v60 = vmul.f32 %v1034_v59, %v719_v57  ;;  %v1035_v61 = vmul.f32 %v1034_v59, %v718_v58 }
 0x6ed   : > { %1303 = vmatprep.mubr.msk.f32.mxu0 %vm637_vm1, %v1035_v61 }
 0x6ee   : > { %1304 = vmatmul.mubr.msk.f32.vlgmr.msra.gmra.mrb[4].mxu0 %vm637_vm1, %v1036_v60 }
 0x6ef   : > { %1154 = vmatpush1.bf16.msra.mxu0 %v1523_v27  ;;  %1185 = vmatprep.mubr.bf16.mxu0 %v1396_v0 }
 0x7c1   : > { %v1305_v63 = vpop.f32.mrb[4].mxu0 }
 0x7c2   : > { %v1126_v55 = vadd.f32 %v1305_v63, %v1280_v62  ;;  %v1120_v57 = vpop.f32.mrb[5].mxu0 }
 0x7c3   : > { %v1121_v56 = vadd.f32 %v1280_v62, %v1120_v57 }
 0x7c5   : > { %v1129_v58 = vpack.c.bf16 %v1126_v55, %v1121_v56 }
 0x7c7   : > { %1130 = vxpose.xlu1.c.b16.start.end [1/1] (short) (narrow) %v1129_v58, 32 }
 0x82d   : > { %v1138_v1 = vpop.trf.xlu1 }
 0x82e   : > { %1283 = vmatmul.mubr.msk.bf16.vlgmr.msra.gmra.mrb[8].mxu0 %vm1146_vm0, %v1138_v1 }
 0x831   : > { %v1139_v27 = vpop.trf.xlu1 }
 0x832   : > { %1284 = vmatmul.mubr.msk.bf16.vlgmr.msra.gmra.mrb[4].mxu1 %vm1146_vm0, %v1139_v27 }
 0x901   : > { %v1187_v0 = vpop.f32.mrb[8].mxu0 }
 0x902   : > { %v1188_v3 = vadd.f32 %v1380_v2, %v1187_v0  ;;  %v1189_v4 = vpop.f32.mrb[9].mxu0 }
 0x903   : > { %v1190_v6 = vadd.f32 %v1381_v5, %v1189_v4  ;;  %v1191_v7 = vpop.f32.mrb[10].mxu0 }
 0x904   : > { %1206 = vst [vmem:[%s1684_s22] sm:$0xff] %v1188_v3  ;;  %v1192_v9 = vadd.f32 %v1382_v8, %v1191_v7  ;;  %v1193_v10 = vpop.f32.mrb[11].mxu0 }
 0x905   : > { %1207 = vst [vmem:[%s1684_s22 + $0x8] sm:$0xff] %v1190_v6  ;;  %v1194_v12 = vadd.f32 %v1383_v11, %v1193_v10  ;;  %v1197_v13 = vpop.f32.mrb[4].mxu1 }
 0x906   : > { %1208 = vst [vmem:[%s1684_s22 + $0x10] sm:$0xff] %v1192_v9  ;;  %v1198_v15 = vadd.f32 %v1384_v14, %v1197_v13  ;;  %v1199_v16 = vpop.f32.mrb[5].mxu1 }
 0x907   : > { %1209 = vst [vmem:[%s1684_s22 + $0x18] sm:$0xff] %v1194_v12  ;;  %v1200_v18 = vadd.f32 %v1385_v17, %v1199_v16  ;;  %v1201_v19 = vpop.f32.mrb[6].mxu1 }
 0x908   : > { %1210 = vst [vmem:[%s1684_s22 + $0x20] sm:$0xff] %v1198_v15  ;;  %v1202_v21 = vadd.f32 %v1386_v20, %v1201_v19  ;;  %v1203_v22 = vpop.f32.mrb[7].mxu1 }
 0x909   : > { %1211 = vst [vmem:[%s1684_s22 + $0x28] sm:$0xff] %v1200_v18  ;;  %v1204_v24 = vadd.f32 %v1387_v23, %v1203_v22 }
 0x90a   : > { %1212 = vst [vmem:[%s1684_s22 + $0x30] sm:$0xff] %v1202_v21 }
 0x90b   : > { %1213 = vst [vmem:[%s1684_s22 + $0x38] sm:$0xff] %v1204_v24 }
 0x90c PF: > { %s23_s25 = sadd.s32 1, %s1394_s25  }
 0x90d   : > { %p20_p4 = scmp.ge.s32.totalorder %s23_s25, 4  }
 0x90f   :  { %22 = sbr.rel (!%p20_p4) target bundleno = 1 (0x1), region = 102 }

</bundles_post_ra>
